<compile_context>
chip_gen: v6e
topology: v6e:2x2x1
jax: 0.10.0
libtpu: 0.0.40
codegen_flags: <defaults>
</compile_context>

<pallas_src>
from functools import partial

import numpy as np

import jax
import jax.numpy as jnp
from jax.experimental import pallas as pl
from jax.experimental.pallas import tpu as pltpu


def _round_up(x, m):
    return ((x + m - 1) // m) * m


# ----------------------------------------------------------------------------
# Kernel
# ----------------------------------------------------------------------------
def style_block_kernel(x_ref, w_ref, gamma_ref, beta_ref, pos_ref, seg_up_ref,
                       o_ref, patch_ref, *, L, K, pad, negative_slope, eps):
    """StyleBlock forward for one batch tile, batch folded onto lanes.

    x_ref      : (C_in_p, Bt*L)       input tile, batch folded onto lanes (conv dtype)
    w_ref      : (C_out_p, K*C_in_p)  conv weight, column = k*C_in_p + ci (conv dtype)
    gamma_ref  : (1, C_out_p, Bt)     AdaIN gamma for this batch tile (f32)
    beta_ref   : (1, C_out_p, Bt)     AdaIN beta for this batch tile (f32)
    pos_ref    : (1, Bt*L) int32      lane position within its length-L segment
    seg_up_ref : (Bt, Bt*L) f32       0/1 segment indicator (batch -> lanes)
    o_ref      : (Bt, C_out_p, L)     output in (batch, channel, length) layout
    patch_ref  : (K*C_in_p, Bt*L)     VMEM scratch for the im2col slab (conv dtype)
    """
    C_in_p = x_ref.shape[0]
    Bt, C_out_p, _ = o_ref.shape

    x2 = x_ref[...]                                   # (C_in_p, N)
    pos = pos_ref[...]                                # (1, N) int32

    # ---- im2col along sublanes (halo in-kernel; 1 compare per tap) ----------
    for k in range(K):
        d = k - pad
        if d == 0:
            patch_ref[k * C_in_p:(k + 1) * C_in_p, :] = x2
        else:
            shifted = jnp.roll(x2, shift=-d, axis=1)          # lane rotate
            valid = (pos < L - d) if d > 0 else (pos >= -d)   # zero the halo
            patch_ref[k * C_in_p:(k + 1) * C_in_p, :] = jnp.where(
                valid, shifted, jnp.zeros_like(shifted))

    # ---- Conv1d as ONE MXU matmul (bf16 operands, f32 accumulation) ---------
    # Conv bias omitted on purpose: cancelled by the instance-norm mean below.
    y = jnp.dot(w_ref[...], patch_ref[...],
                preferred_element_type=jnp.float32)           # (C_out_p, N) f32

    # Per-channel centering over the whole tile (cheap XLU lane reduce).  This
    # removes the DC offset before squaring so the single-pass variance below
    # does not suffer E[y^2] - E[y]^2 cancellation; the shift cancels exactly
    # in the instance-norm math.
    yc = y - jnp.mean(y, axis=1, keepdims=True)               # (C_out_p, N)

    # ---- Instance-norm stats: ONE stacked trans-B matmul --------------------
    seg_up = seg_up_ref[...]                                  # (Bt, N) f32
    stats = jax.lax.dot_general(
        jnp.concatenate([yc, yc * yc], axis=0), seg_up,       # (2*C_out_p, N) @ (Bt, N)^T
        dimension_numbers=(((1,), (1,)), ((), ())),
        preferred_element_type=jnp.float32) * jnp.float32(1.0 / L)
    mean = stats[:C_out_p]                                    # (C_out_p, Bt)
    var = stats[C_out_p:] - mean * mean
    inv_std = jax.lax.rsqrt(var + eps)

    # ---- AdaIN affine (style linear hoisted to the wrapper) -----------------
    gamma = gamma_ref[0]                                      # (C_out_p, Bt)
    beta = beta_ref[0]
    scale = gamma * inv_std
    shift = beta - scale * mean

    # ONE stacked broadcast matmul (batch -> lanes)
    bb = jnp.dot(jnp.concatenate([scale, shift], axis=0), seg_up,
                 preferred_element_type=jnp.float32)          # (2*C_out_p, N)
    out = yc * bb[:C_out_p] + bb[C_out_p:]

    # ---- LeakyReLU(0.2) ------------------------------------------------------
    out = jnp.where(out > 0, out, negative_slope * out)

    # ---- Store directly in (batch, channel, length) layout ------------------
    # NOTE: for L << 128 a folded (C_out, B*L) output would be lane-denser; for
    # realistic L (multiple of 128) each per-batch slice store is lane-dense.
    for b in range(Bt):
        o_ref[b, :, :] = out[:, b * L:(b + 1) * L].astype(o_ref.dtype)


# ----------------------------------------------------------------------------
# VMEM budgeting / tile selection
# ----------------------------------------------------------------------------
def _vmem_estimate(Bt, *, L, C_in_p, C_out_p, K, conv_bytes, out_bytes):
    N = Bt * L
    est = 2 * C_in_p * N * conv_bytes                 # x tile, double-buffered
    est += 2 * C_out_p * N * out_bytes                # out tile, double-buffered
    est += K * C_in_p * N * conv_bytes                # im2col scratch
    est += 2 * C_out_p * K * C_in_p * conv_bytes      # weights
    est += 2 * max(Bt, 8) * N * 4                     # seg_up (sublane padded)
    est += 2 * 8 * N * 4                              # pos row (sublane padded)
    est += 8 * C_out_p * N * 4                        # live f32 temporaries (y, yc, stacks, bb, out)
    return est


def _pick_block_batch(B, L, C_in_p, C_out_p, K, conv_bytes, out_bytes, budget):
    def est(d):
        return _vmem_estimate(d, L=L, C_in_p=C_in_p, C_out_p=C_out_p, K=K,
                              conv_bytes=conv_bytes, out_bytes=out_bytes)

    divisors = [d for d in range(1, B + 1) if B % d == 0]
    # Lane-aligned tiles only: Bt*L % 128 == 0, or the degenerate full-batch tile
    # (block == full array) which is always legal.
    lane_ok = [d for d in divisors if d == B or (d * L) % 128 == 0]
    # Prefer >= 2 grid steps (auto double-buffer pipelining + both v7x
    # TensorCores), picking the biggest tile that fits the VMEM budget.
    pipelined = [d for d in lane_ok if B // d >= 2 and est(d) <= budget]
    if pipelined:
        return max(pipelined)
    fitting = [d for d in lane_ok if est(d) <= budget]
    if fitting:
        return max(fitting)
    return min(lane_ok)


# ----------------------------------------------------------------------------
# Wrapper
# ----------------------------------------------------------------------------
def style_block(x, style, params, *, negative_slope=0.2, eps=1e-5,
                block_batch=None, conv_dtype=jnp.bfloat16):
    """x: (B, C_in, L) f32, style: (B, style_dim) f32 -> (B, C_out, L) f32."""
    B, C_in, L = x.shape
    conv_w = params["conv_w"]                         # (C_out, C_in, K)
    style_w, style_b = params["style_w"], params["style_b"]
    C_out, _, K = conv_w.shape
    pad = (K - 1) // 2
    assert K % 2 == 1, "even kernel_size not supported (output length changes)"
    # params["conv_b"] is intentionally unused: cancelled by instance norm.

    conv_dtype = np.dtype(conv_dtype) if conv_dtype is not None else np.dtype(x.dtype)
    conv_bytes = conv_dtype.itemsize
    sub_pack = 8 * (4 // conv_bytes)                  # 8 rows f32, 16 rows bf16
    C_in_p = _round_up(C_in, sub_pack)
    C_out_p = _round_up(C_out, 8)

    # ---- per-generation VMEM limit (v7x: 64 MiB physical; v5e/v6e: 128 MiB) --
    try:
        vmem_cap = int(pltpu.get_tpu_info().vmem_capacity_bytes)
    except Exception:
        vmem_cap = 64 * 1024 * 1024                   # safe on every generation
    vmem_limit = min(int(vmem_cap * 0.8), 100 * 1024 * 1024)
    tile_budget = int(vmem_limit * 0.75)

    if block_batch is None:
        Bt = _pick_block_batch(B, L, C_in_p, C_out_p, K, conv_bytes, 4, tile_budget)
    else:
        Bt = block_batch
        assert B % Bt == 0, "block_batch must divide B"
        assert Bt == B or (Bt * L) % 128 == 0, \
            "need block_batch == B or block_batch*L % 128 == 0 (lane-aligned tiles)"
    G = B // Bt

    # ---- wrapper-side layout plumbing & hoisted style linear -----------------
    x2 = jnp.transpose(x, (1, 0, 2)).reshape(C_in, B * L)        # fold batch onto lanes
    if C_in_p > C_in:
        x2 = jnp.pad(x2, ((0, C_in_p - C_in), (0, 0)))
    x2 = x2.astype(conv_dtype)

    w = conv_w
    if C_out_p > C_out or C_in_p > C_in:
        w = jnp.pad(w, ((0, C_out_p - C_out), (0, C_in_p - C_in), (0, 0)))
    w2 = jnp.transpose(w, (0, 2, 1)).reshape(C_out_p, K * C_in_p).astype(conv_dtype)

    # Hoisted AdaIN style linear: one batched XLA matmul for the whole batch.
    gb = style @ style_w.T + style_b                             # (B, 2*C_out)
    gamma_t = jnp.transpose(gb[:, :C_out]).astype(jnp.float32)   # (C_out, B)
    beta_t = jnp.transpose(gb[:, C_out:]).astype(jnp.float32)
    if C_out_p > C_out:
        zpad = ((0, C_out_p - C_out), (0, 0))
        gamma_t = jnp.pad(gamma_t, zpad)
        beta_t = jnp.pad(beta_t, zpad)
    # Reshape to (G, C_out_p, Bt): one full-dim (lane-aligned) block per grid step.
    gamma_g = gamma_t.reshape(C_out_p, G, Bt).transpose(1, 0, 2)
    beta_g = beta_t.reshape(C_out_p, G, Bt).transpose(1, 0, 2)

    # Per-tile constant index helpers (identical for every grid step).
    pos_row = jnp.tile(jnp.arange(L, dtype=jnp.int32), Bt).reshape(1, Bt * L)
    n_idx = jnp.arange(Bt * L, dtype=jnp.int32)
    b_idx = jnp.arange(Bt, dtype=jnp.int32)
    seg_up = (n_idx[None, :] // L == b_idx[:, None]).astype(jnp.float32)  # (Bt, Bt*L)

    kernel = partial(style_block_kernel, L=L, K=K, pad=pad,
                     negative_slope=negative_slope, eps=eps)

    def run(single_buffer_consts):
        def const_spec(shape, index_map):
            # Grid-invariant operands: single buffer (their block index never
            # changes, so the default double buffer is pure VMEM waste).
            if single_buffer_consts:
                return pl.BlockSpec(shape, index_map, pipeline_mode=pl.Buffered(1))
            return pl.BlockSpec(shape, index_map)

        grid_spec = pltpu.PrefetchScalarGridSpec(
            num_scalar_prefetch=0,
            grid=(G,),
            in_specs=[
                pl.BlockSpec((C_in_p, Bt * L), lambda g: (0, g)),
                const_spec((C_out_p, K * C_in_p), lambda g: (0, 0)),
                pl.BlockSpec((1, C_out_p, Bt), lambda g: (g, 0, 0)),
                pl.BlockSpec((1, C_out_p, Bt), lambda g: (g, 0, 0)),
                const_spec((1, Bt * L), lambda g: (0, 0)),
                const_spec((Bt, Bt * L), lambda g: (0, 0)),
            ],
            out_specs=pl.BlockSpec((Bt, C_out_p, L), lambda g: (g, 0, 0)),
            scratch_shapes=[pltpu.VMEM((K * C_in_p, Bt * L), conv_dtype)],
        )
        return pl.pallas_call(
            kernel,
            out_shape=jax.ShapeDtypeStruct((B, C_out_p, L), x.dtype),
            grid_spec=grid_spec,
            compiler_params=pltpu.CompilerParams(
                dimension_semantics=("parallel",),
                vmem_limit_bytes=vmem_limit),
        )(x2, w2, gamma_g, beta_g, pos_row, seg_up)

    try:
        out_p = run(True)
    except Exception:
        # pipeline_mode=pl.Buffered(1) not supported on this jax/libtpu build;
        # fall back to default double buffering for the grid-invariant operands.
        out_p = run(False)

    return out_p[:, :C_out, :] if C_out_p > C_out else out_p


# ----------------------------------------------------------------------------
# Pure-JAX reference + init
# ----------------------------------------------------------------------------
def style_block_reference(x, style, params, *, negative_slope=0.2, eps=1e-5):
    """Pure-JAX reference mirroring the PyTorch forward (bias included)."""
    conv_w, conv_b = params["conv_w"], params["conv_b"]
    style_w, style_b = params["style_w"], params["style_b"]
    C_out = conv_w.shape[0]
    pad = (conv_w.shape[2] - 1) // 2

    y = jax.lax.conv_general_dilated(
        x, conv_w, window_strides=(1,), padding=((pad, pad),),
        dimension_numbers=("NCH", "OIH", "NCH")) + conv_b[None, :, None]

    mean = y.mean(axis=-1, keepdims=True)
    var = ((y - mean) ** 2).mean(axis=-1, keepdims=True)
    normed = (y - mean) / jnp.sqrt(var + eps)

    gb = style @ style_w.T + style_b                             # (B, 2*C_out)
    gamma = gb[:, :C_out][:, :, None]
    beta = gb[:, C_out:][:, :, None]
    out = gamma * normed + beta
    return jnp.where(out > 0, out, negative_slope * out)


def init_params(key, in_channel, out_channel, style_dim, kernel_size=3):
    k1, k2, k3 = jax.random.split(key, 3)
    conv_w = 0.1 * jax.random.normal(
        k1, (out_channel, in_channel, kernel_size), jnp.float32)
    conv_b = 0.1 * jax.random.normal(k2, (out_channel,), jnp.float32)
    style_w = 0.1 * jax.random.normal(
        k3, (2 * out_channel, style_dim), jnp.float32)
    # Canonical AdaIN init: gamma-bias = 1, beta-bias = 0.
    style_b = jnp.concatenate(
        [jnp.ones((out_channel,), jnp.float32),
         jnp.zeros((out_channel,), jnp.float32)])
    return {"conv_w": conv_w, "conv_b": conv_b,
            "style_w": style_w, "style_b": style_b}


if __name__ == "__main__":
    B, C_in, C_out, L, STYLE_DIM = 2, 4, 8, 16, 32

    key = jax.random.PRNGKey(0)
    kp, kx, ks = jax.random.split(key, 3)
    params = init_params(kp, C_in, C_out, STYLE_DIM)
    x = jax.random.normal(kx, (B, C_in, L), jnp.float32)
    style = jax.random.normal(ks, (B, STYLE_DIM), jnp.float32)

    ref = style_block_reference(x, style, params)

    # f32 conv path: tight match against the f32 reference.
    out_f32 = jax.block_until_ready(
        style_block(x, style, params, conv_dtype=jnp.float32))
    assert out_f32.shape == (B, C_out, L)
    assert jnp.allclose(out_f32, ref, atol=1e-4, rtol=1e-4), \
        "f32 path mismatch vs reference"

    # Default path (bf16 conv operands, f32 accumulation): MXU-native, looser tol.
    out_bf16 = jax.block_until_ready(style_block(x, style, params))
    assert out_bf16.shape == (B, C_out, L)
    assert jnp.allclose(out_bf16, ref, atol=5e-2, rtol=5e-2), \
        "bf16 path mismatch vs reference"

    print("KERNEL_OK")
</pallas_src>

<mosaic_0001>
module attributes {stable_mosaic.version = 11 : i64} {
  func.func @style_block_kernel(%arg0: i32, %arg1: memref<8x32xf32, #tpu.memory_space<vmem>>, %arg2: memref<8x24xf32, #tpu.memory_space<vmem>>, %arg3: memref<1x8x2xf32, #tpu.memory_space<vmem>>, %arg4: memref<1x8x2xf32, #tpu.memory_space<vmem>>, %arg5: memref<1x32xi32, #tpu.memory_space<vmem>>, %arg6: memref<2x32xf32, #tpu.memory_space<vmem>>, %arg7: memref<2x8x16xf32, #tpu.memory_space<vmem>>, %arg8: memref<24x32xf32, #tpu.memory_space<vmem>>) attributes {dimension_semantics = [#tpu.dimension_semantics<parallel>], iteration_bounds = array<i64: 1>, scalar_prefetch = 0 : i64, scratch_operands = 1 : i64, tpu.core_type = #tpu.core_type<tc>, window_params = [{transform_indices = @transform_0, window_bounds = array<i64: 8, 32>}, {pipeline_mode = #tpu.pipeline_mode<synchronous>, transform_indices = @transform_1, window_bounds = array<i64: 8, 24>}, {transform_indices = @transform_2, window_bounds = array<i64: 1, 8, 2>}, {transform_indices = @transform_3, window_bounds = array<i64: 1, 8, 2>}, {pipeline_mode = #tpu.pipeline_mode<synchronous>, transform_indices = @transform_4, window_bounds = array<i64: 1, 32>}, {pipeline_mode = #tpu.pipeline_mode<synchronous>, transform_indices = @transform_5, window_bounds = array<i64: 2, 32>}, {transform_indices = @transform_6, window_bounds = array<i64: 2, 8, 16>}]} {
    %c0 = arith.constant 0 : index
    %c0_0 = arith.constant 0 : index
    %0 = vector.load %arg1[%c0, %c0_0] : memref<8x32xf32, #tpu.memory_space<vmem>>, vector<8x32xf32>
    %c0_1 = arith.constant 0 : index
    %c0_2 = arith.constant 0 : index
    %1 = vector.load %arg5[%c0_1, %c0_2] : memref<1x32xi32, #tpu.memory_space<vmem>>, vector<1x32xi32>
    %2 = vector.extract_strided_slice %0 {offsets = [0, 31], sizes = [8, 1], strides = [1, 1]} : vector<8x32xf32> to vector<8x1xf32>
    %3 = vector.extract_strided_slice %0 {offsets = [0, 0], sizes = [8, 31], strides = [1, 1]} : vector<8x32xf32> to vector<8x31xf32>
    %4 = tpu.concatenate %2, %3 in 1 : vector<8x1xf32>, vector<8x31xf32> -> vector<8x32xf32>
    %c1_i32 = arith.constant 1 : i32
    %5 = vector.broadcast %c1_i32 : i32 to vector<1x32xi32>
    %6 = arith.cmpi sge, %1, %5 : vector<1x32xi32>
    %cst = arith.constant 0.000000e+00 : f32
    %7 = vector.broadcast %cst : f32 to vector<8x32xf32>
    %8 = vector.shape_cast %6 : vector<1x32xi1> to vector<1x32xi1>
    %9 = vector.broadcast %8 : vector<1x32xi1> to vector<8x32xi1>
    %10 = arith.select %9, %4, %7 : vector<8x32xi1>, vector<8x32xf32>
    %c0_3 = arith.constant 0 : index
    %c0_4 = arith.constant 0 : index
    %11 = vector.load %arg8[%c0_3, %c0_4] : memref<24x32xf32, #tpu.memory_space<vmem>>, vector<8x32xf32>
    tpu.vector_store %arg8[%c0_3, %c0_4], %10 {strides = array<i32>} : memref<24x32xf32, #tpu.memory_space<vmem>>, vector<8x32xf32>,
    %c8 = arith.constant 8 : index
    %c0_5 = arith.constant 0 : index
    %12 = vector.load %arg8[%c8, %c0_5] : memref<24x32xf32, #tpu.memory_space<vmem>>, vector<8x32xf32>
    tpu.vector_store %arg8[%c8, %c0_5], %0 {strides = array<i32>} : memref<24x32xf32, #tpu.memory_space<vmem>>, vector<8x32xf32>,
    %13 = vector.extract_strided_slice %0 {offsets = [0, 1], sizes = [8, 31], strides = [1, 1]} : vector<8x32xf32> to vector<8x31xf32>
    %14 = vector.extract_strided_slice %0 {offsets = [0, 0], sizes = [8, 1], strides = [1, 1]} : vector<8x32xf32> to vector<8x1xf32>
    %15 = tpu.concatenate %13, %14 in 1 : vector<8x31xf32>, vector<8x1xf32> -> vector<8x32xf32>
    %c15_i32 = arith.constant 15 : i32
    %16 = vector.broadcast %c15_i32 : i32 to vector<1x32xi32>
    %17 = arith.cmpi slt, %1, %16 : vector<1x32xi32>
    %cst_6 = arith.constant 0.000000e+00 : f32
    %18 = vector.broadcast %cst_6 : f32 to vector<8x32xf32>
    %19 = vector.shape_cast %17 : vector<1x32xi1> to vector<1x32xi1>
    %20 = vector.broadcast %19 : vector<1x32xi1> to vector<8x32xi1>
    %21 = arith.select %20, %15, %18 : vector<8x32xi1>, vector<8x32xf32>
    %c16 = arith.constant 16 : index
    %c0_7 = arith.constant 0 : index
    %22 = vector.load %arg8[%c16, %c0_7] : memref<24x32xf32, #tpu.memory_space<vmem>>, vector<8x32xf32>
    tpu.vector_store %arg8[%c16, %c0_7], %21 {strides = array<i32>} : memref<24x32xf32, #tpu.memory_space<vmem>>, vector<8x32xf32>,
    %c0_8 = arith.constant 0 : index
    %c0_9 = arith.constant 0 : index
    %23 = vector.load %arg2[%c0_8, %c0_9] : memref<8x24xf32, #tpu.memory_space<vmem>>, vector<8x24xf32>
    %c0_10 = arith.constant 0 : index
    %c0_11 = arith.constant 0 : index
    %24 = vector.load %arg8[%c0_10, %c0_11] : memref<24x32xf32, #tpu.memory_space<vmem>>, vector<24x32xf32>
    %cst_12 = arith.constant dense<0.000000e+00> : vector<8x32xf32>
    %25 = tpu.matmul %23, %24, %cst_12 {dimension_numbers = #tpu.dot_dimension_numbers<[1], [0], [0], [1], [0, 0, 1, 1], [], []>} : vector<8x24xf32>, vector<24x32xf32>, vector<8x32xf32> -> vector<8x32xf32>
    %cst_13 = arith.constant dense<0.000000e+00> : vector<8xf32>
    %26 = vector.multi_reduction <add>, %25, %cst_13 [1] : vector<8x32xf32> to vector<8xf32>
    %27 = vector.shape_cast %26 : vector<8xf32> to vector<8x1xf32>
    %cst_14 = arith.constant 3.200000e+01 : f32
    %28 = vector.broadcast %cst_14 : f32 to vector<8x1xf32>
    %29 = arith.divf %27, %28 : vector<8x1xf32>
    %30 = vector.broadcast %29 : vector<8x1xf32> to vector<8x32xf32>
    %31 = arith.subf %25, %30 : vector<8x32xf32>
    %c0_15 = arith.constant 0 : index
    %c0_16 = arith.constant 0 : index
    %32 = vector.load %arg6[%c0_15, %c0_16] : memref<2x32xf32, #tpu.memory_space<vmem>>, vector<2x32xf32>
    %33 = arith.mulf %31, %31 : vector<8x32xf32>
    %34 = tpu.concatenate %31, %33 in 0 : vector<8x32xf32>, vector<8x32xf32> -> vector<16x32xf32>
    %cst_17 = arith.constant dense<0.000000e+00> : vector<16x2xf32>
    %35 = tpu.matmul %34, %32, %cst_17 {dimension_numbers = #tpu.dot_dimension_numbers<[1], [1], [0], [0], [0, 0, 1, 0], [], []>} : vector<16x32xf32>, vector<2x32xf32>, vector<16x2xf32> -> vector<16x2xf32>
    %cst_18 = arith.constant 6.250000e-02 : f32
    %36 = vector.broadcast %cst_18 : f32 to vector<16x2xf32>
    %37 = arith.mulf %35, %36 : vector<16x2xf32>
    %38 = vector.extract_strided_slice %37 {offsets = [0, 0], sizes = [8, 2], strides = [1, 1]} : vector<16x2xf32> to vector<8x2xf32>
    %39 = vector.extract_strided_slice %37 {offsets = [8, 0], sizes = [8, 2], strides = [1, 1]} : vector<16x2xf32> to vector<8x2xf32>
    %40 = arith.mulf %38, %38 : vector<8x2xf32>
    %41 = arith.subf %39, %40 : vector<8x2xf32>
    %cst_19 = arith.constant 9.99999974E-6 : f32
    %42 = vector.broadcast %cst_19 : f32 to vector<8x2xf32>
    %43 = arith.addf %41, %42 : vector<8x2xf32>
    %44 = math.rsqrt %43 : vector<8x2xf32>
    %c0_20 = arith.constant 0 : index
    %c0_21 = arith.constant 0 : index
    %c0_22 = arith.constant 0 : index
    %45 = vector.load %arg3[%c0_20, %c0_21, %c0_22] : memref<1x8x2xf32, #tpu.memory_space<vmem>>, vector<1x8x2xf32>
    %46 = vector.shape_cast %45 : vector<1x8x2xf32> to vector<8x2xf32>
    %c0_23 = arith.constant 0 : index
    %c0_24 = arith.constant 0 : index
    %c0_25 = arith.constant 0 : index
    %47 = vector.load %arg4[%c0_23, %c0_24, %c0_25] : memref<1x8x2xf32, #tpu.memory_space<vmem>>, vector<1x8x2xf32>
    %48 = vector.shape_cast %47 : vector<1x8x2xf32> to vector<8x2xf32>
    %49 = arith.mulf %46, %44 : vector<8x2xf32>
    %50 = arith.mulf %49, %38 : vector<8x2xf32>
    %51 = arith.subf %48, %50 : vector<8x2xf32>
    %52 = tpu.concatenate %49, %51 in 0 : vector<8x2xf32>, vector<8x2xf32> -> vector<16x2xf32>
    %cst_26 = arith.constant dense<0.000000e+00> : vector<16x32xf32>
    %53 = tpu.matmul %52, %32, %cst_26 {dimension_numbers = #tpu.dot_dimension_numbers<[1], [0], [0], [1], [0, 0, 1, 1], [], []>} : vector<16x2xf32>, vector<2x32xf32>, vector<16x32xf32> -> vector<16x32xf32>
    %54 = vector.extract_strided_slice %53 {offsets = [0, 0], sizes = [8, 32], strides = [1, 1]} : vector<16x32xf32> to vector<8x32xf32>
    %55 = arith.mulf %31, %54 : vector<8x32xf32>
    %56 = vector.extract_strided_slice %53 {offsets = [8, 0], sizes = [8, 32], strides = [1, 1]} : vector<16x32xf32> to vector<8x32xf32>
    %57 = arith.addf %55, %56 : vector<8x32xf32>
    %cst_27 = arith.constant 0.000000e+00 : f32
    %58 = vector.broadcast %cst_27 : f32 to vector<8x32xf32>
    %59 = arith.cmpf ogt, %57, %58 : vector<8x32xf32>
    %cst_28 = arith.constant 2.000000e-01 : f32
    %60 = vector.broadcast %cst_28 : f32 to vector<8x32xf32>
    %61 = arith.mulf %60, %57 : vector<8x32xf32>
    %62 = arith.select %59, %57, %61 : vector<8x32xi1>, vector<8x32xf32>
    %63 = vector.extract_strided_slice %62 {offsets = [0, 0], sizes = [8, 16], strides = [1, 1]} : vector<8x32xf32> to vector<8x16xf32>
    %c0_29 = arith.constant 0 : index
    %c0_30 = arith.constant 0 : index
    %c0_31 = arith.constant 0 : index
    %64 = vector.load %arg7[%c0_29, %c0_30, %c0_31] : memref<2x8x16xf32, #tpu.memory_space<vmem>>, vector<1x8x16xf32>
    %65 = vector.shape_cast %64 : vector<1x8x16xf32> to vector<8x16xf32>
    %66 = vector.shape_cast %63 : vector<8x16xf32> to vector<1x8x16xf32>
    tpu.vector_store %arg7[%c0_29, %c0_30, %c0_31], %66 {strides = array<i32>} : memref<2x8x16xf32, #tpu.memory_space<vmem>>, vector<1x8x16xf32>,
    %67 = vector.extract_strided_slice %62 {offsets = [0, 16], sizes = [8, 16], strides = [1, 1]} : vector<8x32xf32> to vector<8x16xf32>
    %c1 = arith.constant 1 : index
    %c0_32 = arith.constant 0 : index
    %c0_33 = arith.constant 0 : index
    %68 = vector.load %arg7[%c1, %c0_32, %c0_33] : memref<2x8x16xf32, #tpu.memory_space<vmem>>, vector<1x8x16xf32>
    %69 = vector.shape_cast %68 : vector<1x8x16xf32> to vector<8x16xf32>
    %70 = vector.shape_cast %67 : vector<8x16xf32> to vector<1x8x16xf32>
    tpu.vector_store %arg7[%c1, %c0_32, %c0_33], %70 {strides = array<i32>} : memref<2x8x16xf32, #tpu.memory_space<vmem>>, vector<1x8x16xf32>,
    return
  }
  func.func @transform_0(%arg0: i32) -> (i32, i32) {
    %c0_i32 = arith.constant 0 : i32
    %c0_i32_0 = arith.constant 0 : i32
    return %c0_i32, %arg0 : i32, i32
  }
  func.func @transform_1(%arg0: i32) -> (i32, i32) {
    %c0_i32 = arith.constant 0 : i32
    %c0_i32_0 = arith.constant 0 : i32
    %c0_i32_1 = arith.constant 0 : i32
    return %c0_i32, %c0_i32_0 : i32, i32
  }
  func.func @transform_2(%arg0: i32) -> (i32, i32, i32) {
    %c0_i32 = arith.constant 0 : i32
    %c0_i32_0 = arith.constant 0 : i32
    %c0_i32_1 = arith.constant 0 : i32
    return %arg0, %c0_i32, %c0_i32_0 : i32, i32, i32
  }
  func.func @transform_3(%arg0: i32) -> (i32, i32, i32) {
    %c0_i32 = arith.constant 0 : i32
    %c0_i32_0 = arith.constant 0 : i32
    %c0_i32_1 = arith.constant 0 : i32
    return %arg0, %c0_i32, %c0_i32_0 : i32, i32, i32
  }
  func.func @transform_4(%arg0: i32) -> (i32, i32) {
    %c0_i32 = arith.constant 0 : i32
    %c0_i32_0 = arith.constant 0 : i32
    %c0_i32_1 = arith.constant 0 : i32
    return %c0_i32, %c0_i32_0 : i32, i32
  }
  func.func @transform_5(%arg0: i32) -> (i32, i32) {
    %c0_i32 = arith.constant 0 : i32
    %c0_i32_0 = arith.constant 0 : i32
    %c0_i32_1 = arith.constant 0 : i32
    return %c0_i32, %c0_i32_0 : i32, i32
  }
  func.func @transform_6(%arg0: i32) -> (i32, i32, i32) {
    %c0_i32 = arith.constant 0 : i32
    %c0_i32_0 = arith.constant 0 : i32
    %c0_i32_1 = arith.constant 0 : i32
    return %arg0, %c0_i32, %c0_i32_0 : i32, i32, i32
  }
}

module attributes {stable_mosaic.version = 11 : i64} {
  func.func @style_block_kernel(%arg0: i32, %arg1: memref<8x32xf32, #tpu.memory_space<vmem>>, %arg2: memref<8x24xf32, #tpu.memory_space<vmem>>, %arg3: memref<1x8x2xf32, #tpu.memory_space<vmem>>, %arg4: memref<1x8x2xf32, #tpu.memory_space<vmem>>, %arg5: memref<1x32xi32, #tpu.memory_space<vmem>>, %arg6: memref<2x32xf32, #tpu.memory_space<vmem>>, %arg7: memref<2x8x16xf32, #tpu.memory_space<vmem>>, %arg8: memref<24x32xf32, #tpu.memory_space<vmem>>) attributes {dimension_semantics = [#tpu.dimension_semantics<parallel>], iteration_bounds = array<i64: 1>, scalar_prefetch = 0 : i64, scratch_operands = 1 : i64, tpu.core_type = #tpu.core_type<tc>, window_params = [{transform_indices = @transform_0, window_bounds = array<i64: 8, 32>}, {pipeline_mode = #tpu.pipeline_mode<synchronous>, transform_indices = @transform_1, window_bounds = array<i64: 8, 24>}, {transform_indices = @transform_2, window_bounds = array<i64: 1, 8, 2>}, {transform_indices = @transform_3, window_bounds = array<i64: 1, 8, 2>}, {pipeline_mode = #tpu.pipeline_mode<synchronous>, transform_indices = @transform_4, window_bounds = array<i64: 1, 32>}, {pipeline_mode = #tpu.pipeline_mode<synchronous>, transform_indices = @transform_5, window_bounds = array<i64: 2, 32>}, {transform_indices = @transform_6, window_bounds = array<i64: 2, 8, 16>}]} {
    %c0 = arith.constant 0 : index
    %c0_0 = arith.constant 0 : index
    %0 = vector.load %arg1[%c0, %c0_0] : memref<8x32xf32, #tpu.memory_space<vmem>>, vector<8x32xf32>
    %c0_1 = arith.constant 0 : index
    %c0_2 = arith.constant 0 : index
    %1 = vector.load %arg5[%c0_1, %c0_2] : memref<1x32xi32, #tpu.memory_space<vmem>>, vector<1x32xi32>
    %2 = vector.extract_strided_slice %0 {offsets = [0, 31], sizes = [8, 1], strides = [1, 1]} : vector<8x32xf32> to vector<8x1xf32>
    %3 = vector.extract_strided_slice %0 {offsets = [0, 0], sizes = [8, 31], strides = [1, 1]} : vector<8x32xf32> to vector<8x31xf32>
    %4 = tpu.concatenate %2, %3 in 1 : vector<8x1xf32>, vector<8x31xf32> -> vector<8x32xf32>
    %c1_i32 = arith.constant 1 : i32
    %5 = vector.broadcast %c1_i32 : i32 to vector<1x32xi32>
    %6 = arith.cmpi sge, %1, %5 : vector<1x32xi32>
    %cst = arith.constant 0.000000e+00 : f32
    %7 = vector.broadcast %cst : f32 to vector<8x32xf32>
    %8 = vector.shape_cast %6 : vector<1x32xi1> to vector<1x32xi1>
    %9 = vector.broadcast %8 : vector<1x32xi1> to vector<8x32xi1>
    %10 = arith.select %9, %4, %7 : vector<8x32xi1>, vector<8x32xf32>
    %c0_3 = arith.constant 0 : index
    %c0_4 = arith.constant 0 : index
    %11 = vector.load %arg8[%c0_3, %c0_4] : memref<24x32xf32, #tpu.memory_space<vmem>>, vector<8x32xf32>
    tpu.vector_store %arg8[%c0_3, %c0_4], %10 {strides = array<i32>} : memref<24x32xf32, #tpu.memory_space<vmem>>, vector<8x32xf32>,
    %c8 = arith.constant 8 : index
    %c0_5 = arith.constant 0 : index
    %12 = vector.load %arg8[%c8, %c0_5] : memref<24x32xf32, #tpu.memory_space<vmem>>, vector<8x32xf32>
    tpu.vector_store %arg8[%c8, %c0_5], %0 {strides = array<i32>} : memref<24x32xf32, #tpu.memory_space<vmem>>, vector<8x32xf32>,
    %13 = vector.extract_strided_slice %0 {offsets = [0, 1], sizes = [8, 31], strides = [1, 1]} : vector<8x32xf32> to vector<8x31xf32>
    %14 = vector.extract_strided_slice %0 {offsets = [0, 0], sizes = [8, 1], strides = [1, 1]} : vector<8x32xf32> to vector<8x1xf32>
    %15 = tpu.concatenate %13, %14 in 1 : vector<8x31xf32>, vector<8x1xf32> -> vector<8x32xf32>
    %c15_i32 = arith.constant 15 : i32
    %16 = vector.broadcast %c15_i32 : i32 to vector<1x32xi32>
    %17 = arith.cmpi slt, %1, %16 : vector<1x32xi32>
    %cst_6 = arith.constant 0.000000e+00 : f32
    %18 = vector.broadcast %cst_6 : f32 to vector<8x32xf32>
    %19 = vector.shape_cast %17 : vector<1x32xi1> to vector<1x32xi1>
    %20 = vector.broadcast %19 : vector<1x32xi1> to vector<8x32xi1>
    %21 = arith.select %20, %15, %18 : vector<8x32xi1>, vector<8x32xf32>
    %c16 = arith.constant 16 : index
    %c0_7 = arith.constant 0 : index
    %22 = vector.load %arg8[%c16, %c0_7] : memref<24x32xf32, #tpu.memory_space<vmem>>, vector<8x32xf32>
    tpu.vector_store %arg8[%c16, %c0_7], %21 {strides = array<i32>} : memref<24x32xf32, #tpu.memory_space<vmem>>, vector<8x32xf32>,
    %c0_8 = arith.constant 0 : index
    %c0_9 = arith.constant 0 : index
    %23 = vector.load %arg2[%c0_8, %c0_9] : memref<8x24xf32, #tpu.memory_space<vmem>>, vector<8x24xf32>
    %c0_10 = arith.constant 0 : index
    %c0_11 = arith.constant 0 : index
    %24 = vector.load %arg8[%c0_10, %c0_11] : memref<24x32xf32, #tpu.memory_space<vmem>>, vector<24x32xf32>
    %cst_12 = arith.constant dense<0.000000e+00> : vector<8x32xf32>
    %25 = tpu.matmul %23, %24, %cst_12 {dimension_numbers = #tpu.dot_dimension_numbers<[1], [0], [0], [1], [0, 0, 1, 1], [], []>} : vector<8x24xf32>, vector<24x32xf32>, vector<8x32xf32> -> vector<8x32xf32>
    %cst_13 = arith.constant dense<0.000000e+00> : vector<8xf32>
    %26 = vector.multi_reduction <add>, %25, %cst_13 [1] : vector<8x32xf32> to vector<8xf32>
    %27 = vector.shape_cast %26 : vector<8xf32> to vector<8x1xf32>
    %cst_14 = arith.constant 3.200000e+01 : f32
    %28 = vector.broadcast %cst_14 : f32 to vector<8x1xf32>
    %29 = arith.divf %27, %28 : vector<8x1xf32>
    %30 = vector.broadcast %29 : vector<8x1xf32> to vector<8x32xf32>
    %31 = arith.subf %25, %30 : vector<8x32xf32>
    %c0_15 = arith.constant 0 : index
    %c0_16 = arith.constant 0 : index
    %32 = vector.load %arg6[%c0_15, %c0_16] : memref<2x32xf32, #tpu.memory_space<vmem>>, vector<2x32xf32>
    %33 = arith.mulf %31, %31 : vector<8x32xf32>
    %34 = tpu.concatenate %31, %33 in 0 : vector<8x32xf32>, vector<8x32xf32> -> vector<16x32xf32>
    %cst_17 = arith.constant dense<0.000000e+00> : vector<16x2xf32>
    %35 = tpu.matmul %34, %32, %cst_17 {dimension_numbers = #tpu.dot_dimension_numbers<[1], [1], [0], [0], [0, 0, 1, 0], [], []>} : vector<16x32xf32>, vector<2x32xf32>, vector<16x2xf32> -> vector<16x2xf32>
    %cst_18 = arith.constant 6.250000e-02 : f32
    %36 = vector.broadcast %cst_18 : f32 to vector<16x2xf32>
    %37 = arith.mulf %35, %36 : vector<16x2xf32>
    %38 = vector.extract_strided_slice %37 {offsets = [0, 0], sizes = [8, 2], strides = [1, 1]} : vector<16x2xf32> to vector<8x2xf32>
    %39 = vector.extract_strided_slice %37 {offsets = [8, 0], sizes = [8, 2], strides = [1, 1]} : vector<16x2xf32> to vector<8x2xf32>
    %40 = arith.mulf %38, %38 : vector<8x2xf32>
    %41 = arith.subf %39, %40 : vector<8x2xf32>
    %cst_19 = arith.constant 9.99999974E-6 : f32
    %42 = vector.broadcast %cst_19 : f32 to vector<8x2xf32>
    %43 = arith.addf %41, %42 : vector<8x2xf32>
    %44 = math.rsqrt %43 : vector<8x2xf32>
    %c0_20 = arith.constant 0 : index
    %c0_21 = arith.constant 0 : index
    %c0_22 = arith.constant 0 : index
    %45 = vector.load %arg3[%c0_20, %c0_21, %c0_22] : memref<1x8x2xf32, #tpu.memory_space<vmem>>, vector<1x8x2xf32>
    %46 = vector.shape_cast %45 : vector<1x8x2xf32> to vector<8x2xf32>
    %c0_23 = arith.constant 0 : index
    %c0_24 = arith.constant 0 : index
    %c0_25 = arith.constant 0 : index
    %47 = vector.load %arg4[%c0_23, %c0_24, %c0_25] : memref<1x8x2xf32, #tpu.memory_space<vmem>>, vector<1x8x2xf32>
    %48 = vector.shape_cast %47 : vector<1x8x2xf32> to vector<8x2xf32>
    %49 = arith.mulf %46, %44 : vector<8x2xf32>
    %50 = arith.mulf %49, %38 : vector<8x2xf32>
    %51 = arith.subf %48, %50 : vector<8x2xf32>
    %52 = tpu.concatenate %49, %51 in 0 : vector<8x2xf32>, vector<8x2xf32> -> vector<16x2xf32>
    %cst_26 = arith.constant dense<0.000000e+00> : vector<16x32xf32>
    %53 = tpu.matmul %52, %32, %cst_26 {dimension_numbers = #tpu.dot_dimension_numbers<[1], [0], [0], [1], [0, 0, 1, 1], [], []>} : vector<16x2xf32>, vector<2x32xf32>, vector<16x32xf32> -> vector<16x32xf32>
    %54 = vector.extract_strided_slice %53 {offsets = [0, 0], sizes = [8, 32], strides = [1, 1]} : vector<16x32xf32> to vector<8x32xf32>
    %55 = arith.mulf %31, %54 : vector<8x32xf32>
    %56 = vector.extract_strided_slice %53 {offsets = [8, 0], sizes = [8, 32], strides = [1, 1]} : vector<16x32xf32> to vector<8x32xf32>
    %57 = arith.addf %55, %56 : vector<8x32xf32>
    %cst_27 = arith.constant 0.000000e+00 : f32
    %58 = vector.broadcast %cst_27 : f32 to vector<8x32xf32>
    %59 = arith.cmpf ogt, %57, %58 : vector<8x32xf32>
    %cst_28 = arith.constant 2.000000e-01 : f32
    %60 = vector.broadcast %cst_28 : f32 to vector<8x32xf32>
    %61 = arith.mulf %60, %57 : vector<8x32xf32>
    %62 = arith.select %59, %57, %61 : vector<8x32xi1>, vector<8x32xf32>
    %63 = vector.extract_strided_slice %62 {offsets = [0, 0], sizes = [8, 16], strides = [1, 1]} : vector<8x32xf32> to vector<8x16xf32>
    %c0_29 = arith.constant 0 : index
    %c0_30 = arith.constant 0 : index
    %c0_31 = arith.constant 0 : index
    %64 = vector.load %arg7[%c0_29, %c0_30, %c0_31] : memref<2x8x16xf32, #tpu.memory_space<vmem>>, vector<1x8x16xf32>
    %65 = vector.shape_cast %64 : vector<1x8x16xf32> to vector<8x16xf32>
    %66 = vector.shape_cast %63 : vector<8x16xf32> to vector<1x8x16xf32>
    tpu.vector_store %arg7[%c0_29, %c0_30, %c0_31], %66 {strides = array<i32>} : memref<2x8x16xf32, #tpu.memory_space<vmem>>, vector<1x8x16xf32>,
    %67 = vector.extract_strided_slice %62 {offsets = [0, 16], sizes = [8, 16], strides = [1, 1]} : vector<8x32xf32> to vector<8x16xf32>
    %c1 = arith.constant 1 : index
    %c0_32 = arith.constant 0 : index
    %c0_33 = arith.constant 0 : index
    %68 = vector.load %arg7[%c1, %c0_32, %c0_33] : memref<2x8x16xf32, #tpu.memory_space<vmem>>, vector<1x8x16xf32>
    %69 = vector.shape_cast %68 : vector<1x8x16xf32> to vector<8x16xf32>
    %70 = vector.shape_cast %67 : vector<8x16xf32> to vector<1x8x16xf32>
    tpu.vector_store %arg7[%c1, %c0_32, %c0_33], %70 {strides = array<i32>} : memref<2x8x16xf32, #tpu.memory_space<vmem>>, vector<1x8x16xf32>,
    return
  }
  func.func @transform_0(%arg0: i32) -> (i32, i32) {
    %c0_i32 = arith.constant 0 : i32
    %c0_i32_0 = arith.constant 0 : i32
    return %c0_i32, %arg0 : i32, i32
  }
  func.func @transform_1(%arg0: i32) -> (i32, i32) {
    %c0_i32 = arith.constant 0 : i32
    %c0_i32_0 = arith.constant 0 : i32
    %c0_i32_1 = arith.constant 0 : i32
    return %c0_i32, %c0_i32_0 : i32, i32
  }
  func.func @transform_2(%arg0: i32) -> (i32, i32, i32) {
    %c0_i32 = arith.constant 0 : i32
    %c0_i32_0 = arith.constant 0 : i32
    %c0_i32_1 = arith.constant 0 : i32
    return %arg0, %c0_i32, %c0_i32_0 : i32, i32, i32
  }
  func.func @transform_3(%arg0: i32) -> (i32, i32, i32) {
    %c0_i32 = arith.constant 0 : i32
    %c0_i32_0 = arith.constant 0 : i32
    %c0_i32_1 = arith.constant 0 : i32
    return %arg0, %c0_i32, %c0_i32_0 : i32, i32, i32
  }
  func.func @transform_4(%arg0: i32) -> (i32, i32) {
    %c0_i32 = arith.constant 0 : i32
    %c0_i32_0 = arith.constant 0 : i32
    %c0_i32_1 = arith.constant 0 : i32
    return %c0_i32, %c0_i32_0 : i32, i32
  }
  func.func @transform_5(%arg0: i32) -> (i32, i32) {
    %c0_i32 = arith.constant 0 : i32
    %c0_i32_0 = arith.constant 0 : i32
    %c0_i32_1 = arith.constant 0 : i32
    return %c0_i32, %c0_i32_0 : i32, i32
  }
  func.func @transform_6(%arg0: i32) -> (i32, i32, i32) {
    %c0_i32 = arith.constant 0 : i32
    %c0_i32_0 = arith.constant 0 : i32
    %c0_i32_1 = arith.constant 0 : i32
    return %arg0, %c0_i32, %c0_i32_0 : i32, i32, i32
  }
}

</mosaic_0001>

<bundles_post_ra>
// kernel: tpu_custom_call.1
= control target key start
LH: loop header
LB: loop body
LE: loop exit
PB: predicated region body
PF: predicated region fallthrough
CT: control target
= control target key end

     0   :  { %vm43_vm0 = vcmask 261120   ;;  %s429_s23 = smov 97   ;;  %s430_s24 = smov 127   ;;  %s504_s0 = inlined_call_operand.vmem [shape: f32[8,32], index: 0, kind: input, shape index: {}]   ;;  %s505_s1 = inlined_call_operand.vmem [shape: f32[8,24], index: 1, kind: input, shape index: {}]   ;;  %s506_s2 = inlined_call_operand.vmem [shape: f32[1,8,2], index: 2, kind: input, shape index: {}]   ;;  %s507_s3 = inlined_call_operand.vmem [shape: f32[1,8,2], index: 3, kind: input, shape index: {}]   ;;  %s508_s4 = inlined_call_operand.vmem [shape: s32[1,32], index: 4, kind: input, shape index: {}]   ;;  %s509_s5 = inlined_call_operand.vmem [shape: f32[2,32], index: 5, kind: input, shape index: {}]   ;;  %s510_s6 = inlined_call_operand.hbm [shape: f32[2,8,16], index: 6, kind: output, shape index: {}]  }
   0x1   :  { %v24_v0 = vld [vmem:[%s504_s0] sm:$0xff] }
   0x2   :  { %27 = vrot.lane.b32.xlu1 %v24_v0, %s429_s23  ;;  %45 = vst.msk [vmem:[#allocation2 + $0x8] sm:$0xff] %vm43_vm0, %v24_v0  ;;  %46 = vrot.lane.b32.xlu0 %v24_v0, %s430_s24 }
   0x3   :  { %11 = vsyncpa [#allocation4], 0  ;;  %v431_v1 = vmov 0.0   ;;  %s432_s25 = smov 1   ;;  %s433_s26 = smov 31   ;;  %vm434_vm1 = vmmov 0   ;;  %v37_v2 = vlaneseq }
   0x4   :  { %375 = vmatprep.subr.mxu0 %v431_v1  ;;  %381 = vmatprep.mubr.msk.f32.mxu0 %vm434_vm1, %v431_v1  ;;  %v25_v3 = vld [vmem:[%s508_s4] sm:$0x1]  ;;  %v435_v6 = vmov 0   ;;  %vm33_vm4 = vcmask 7168   ;;  %vm52_vm5 = vcmask 252928   ;;  %vm67_vm8 = vcmask 195584  }
   0x5   :  { %v38_v4 = vshrl.u32 %v37_v2, 7  ;;  %vm35_vm2 = vcmp.ge.s32.totalorder %v25_v3, 1  ;;  %vm54_vm3 = vcmp.lt.s32.totalorder %v25_v3, 15  ;;  %v63_v21 = vld [vmem:[%s505_s1] sm:$0xff]  ;;  %vm251_vm9 = vcmask 1041408   ;;  %s437_s9 = smov [#allocation3]  }
   0x6   :  { %30 = vrot.lane.b32.xlu1 %v24_v0, %s432_s25  ;;  %49 = vrot.lane.b32.xlu0 %v24_v0, %s433_s26  ;;  %v36_v7 = vsel %vm35_vm2, 1, %v435_v6  ;;  %v55_v8 = vsel %vm54_vm3, 1, %v435_v6  ;;  %v147_v26 = vld [vmem:[%s509_s5] sm:$0x3]  ;;  %vm244_vm10 = vcmask 15360   ;;  %vm334_vm12 = vcmask 130048  }
   0x7   :  { %v39_v5 = vsub.s32 0, %v38_v4  ;;  %384 = vmatprep.subr.msk.mxu1 %vm43_vm0, %v147_v26  ;;  %v239_v38 = vld [vmem:[%s506_s2] sm:$0xff]  ;;  %s436_s2 = smov 112   ;;  %s347_s10 = sshll.u32 %s437_s9, 4  ;;  %s348_s10 = int_to_ptr.vmem [resolvable:$true] %s347_s10 }
   0x8   :  { %385 = vmatpush3.xpose.msk.msra.mxu1 %vm43_vm0, %v147_v26  ;;  %v240_v41 = vld [vmem:[%s507_s3] sm:$0xff]  ;;  %s407_s3 = scalar_lea.vmem %s348_s10, 256  ;;  %p412_p1 = scmp.lt.s32.totalorder %s348_s10, %s348_s10 }
   0x9   :  { %v40_v9 = vrot.slane %v36_v7, %v39_v5  ;;  %v59_v10 = vrot.slane %v55_v8, %v39_v5  ;;  %v65_v20 = vld [vmem:[#allocation2 + $0x8] sm:$0xff]  ;;  %389 = vmatprep.subr.msk.mxu1 %vm251_vm9, %v147_v26  ;;  %p408_p0 = scmp.ne.s32.totalorder %s348_s10, %s407_s3  ;;  %p413_p2 = scmp.lt.s32.totalorder %s407_s3, %s407_s3 }
   0xb   :  { %vm41_vm6 = vcmp.eq.s32.totalorder %v40_v9, 1  ;;  %vm60_vm7 = vcmp.eq.s32.totalorder %v59_v10, 1  ;;  %p414_p3 = por %p413_p2, %p412_p1 }
   0xd   :  { %p415_p4 = pnand %p414_p3, %p408_p0 }
  0x74   :  { %v28_v11 = vpop.permute.xlu1 %27  ;;  %v47_v12 = vpop.permute.xlu0 %46 }
  0x78   :  { %v31_v13 = vpop.permute.xlu1 %30  ;;  %v50_v14 = vpop.permute.xlu0 %49 }
  0x79   :  { %v34_v15 = vsel %vm33_vm4, %v28_v11, %v31_v13  ;;  %v53_v16 = vsel %vm52_vm5, %v47_v12, %v50_v14 }
  0x7a   :  { %v42_v17 = vsel %vm41_vm6, %v34_v15, 0.0  ;;  %v61_v18 = vsel %vm60_vm7, %v53_v16, 0.0 }
  0x7b   :  { %44 = vst.msk [vmem:[#allocation2] sm:$0xff] %vm43_vm0, %v42_v17  ;;  %62 = vst.msk [vmem:[#allocation2 + $0x10] sm:$0xff] %vm43_vm0, %v61_v18 }
  0x82   :  { %v66_v19 = vld [vmem:[#allocation2 + $0x10] sm:$0xff]  ;;  %v64_v22 = vld [vmem:[#allocation2] sm:$0xff] }
  0x83   :  { %376 = vmatpush3.msra.mxu0 %v66_v19 }
  0x84   :  { %377 = vmatprep.subr.mxu0 %v431_v1 }
  0x85   :  { %378 = vmatpush3.msra.mxu0 %v65_v20 }
  0x86   :  { %379 = vmatprep.subr.mxu0 %v431_v1 }
  0x87   :  { %380 = vmatpush3.msra.mxu0 %v64_v22 }
  0x88   :  { %382 = vmatmul.mubr.msk.f32.vlgmr.msra.gmra.mxu0 %vm67_vm8, %v63_v21 }
 0x148   :  { %v137_v23 = vpop.f32.mrf.mxu0 }
 0x149   :  { %v141_v24 = vsel %vm43_vm0, %v137_v23, 0.0 }
 0x14a   :  { %142 = vadd.xlane.f32.xlu0 %v141_v24  ;;  %v383_v25 = vpop.f32.mrf.mxu0 }
 0x1d3   :  { %v143_v27 = vpop.xlane.xlu0 %142 }
 0x1d4   :  { %v145_v28 = vmul.f32 0.03125, %v143_v27 }
 0x1d6   :  { %v146_v29 = vsub.f32 %v137_v23, %v145_v28 }
 0x1d8   :  { %v148_v30 = vmul.f32 %v146_v29, %v146_v29  ;;  %386 = vmatprep.mubr.msk.f32.mxu1 %vm43_vm0, %v146_v29 }
 0x1da   :  { %387 = vmatmul.mubr.msk.f32.vlgmr.msra.gmra.mxu1 %vm43_vm0, %v148_v30 }
 0x1db   :  { %390 = vmatpush3.msk.msra.mxu1 %vm251_vm9, %v147_v26 }
 0x29a   :  { %v388_v31 = vpop.f32.mrf.mxu1 }
 0x29b   :  { %v234_v34 = vmul.f32 0.0625, %v388_v31 }
 0x29c   :  { %v224_v32 = vpop.f32.mrf.mxu1 }
 0x29d   :  { %v233_v33 = vmul.f32 0.0625, %v224_v32 }
 0x29f   :  { %v235_v35 = vmul.f32 %v233_v33, %v233_v33 }
 0x2a1   :  { %v236_v36 = vsub.f32 %v234_v34, %v235_v35 }
 0x2a3   :  { %v237_v37 = vadd.f32 1e-05, %v236_v36 }
 0x2a5   :  { %405 = vrsqrt.f32 %v237_v37 }
 0x2b2   :  { %v406_v39 = vpop.eup %405 }
 0x2b3   :  { %v241_v40 = vmul.f32 %v406_v39, %v239_v38 }
 0x2b5   :  { %v242_v42 = vmul.f32 %v241_v40, %v233_v33  ;;  %391 = vmatprep.mubr.msk.f32.mxu1 %vm244_vm10, %v241_v40 }
 0x2b7   :  { %v243_v43 = vsub.f32 %v240_v41, %v242_v42 }
 0x2b9   :  { %392 = vmatmul.mubr.msk.f32.vlgmr.msra.gmra.mxu1 %vm244_vm10, %v243_v43 }
 0x379   :  { %v393_v44 = vpop.f32.mrf.mxu1 }
 0x37b   :  { %v320_v45 = vpop.f32.mrf.mxu1 }
 0x37c   :  { %v329_v46 = vmul.f32 %v320_v45, %v146_v29 }
 0x37e   :  { %v330_v47 = vadd.f32 %v393_v44, %v329_v46 }
 0x380   :  { %vm331_vm11 = vcmp.gt.f32.partialorder %v330_v47, 0.0  ;;  %v332_v48 = vmul.f32 0.2, %v330_v47 }
 0x382   :  { %v333_v49 = vsel %vm331_vm11, %v330_v47, %v332_v48 }
 0x383   :  { %337 = vrot.lane.b32.xlu1 %v333_v49, %s436_s2  ;;  %335 = vst.msk [vmem:[#allocation3] sm:$0xff] %vm334_vm12, %v333_v49 }
 0x3f5   :  { %v338_v50 = vpop.permute.xlu1 %337 }
 0x3f6   :  { %341 = vst.msk [vmem:[#allocation3 + $0x8] sm:$0xff] %vm334_vm12, %v338_v50 }
 0x3f7   :  { %418 = shalt.err (!%p415_p4)
}
 0x3f8   :  { %s438_s11 = smov 128   ;;  %s439_s12 = smov 8  }
 0x3f9   :  { %353 = dma.vmem_to_hbm [thread:$0]  %s348_s10, 256, %s510_s6, [#allocation4], %s438_s11, %s438_s11, %s439_s12  }
 0x3fa   :  { %427 = dma.done.wait [#allocation4], 256  }
 0x3fb   :  { %428 = vsyncadd [#allocation4], 4294967040 }
 0x3fc   :  { %357 = vsyncpa [#allocation4], 1 }

// kernel: tpu_custom_call.1
= control target key start
LH: loop header
LB: loop body
LE: loop exit
PB: predicated region body
PF: predicated region fallthrough
CT: control target
= control target key end

     0   :  { %vm43_vm0 = vcmask 261120   ;;  %s429_s23 = smov 97   ;;  %s430_s24 = smov 127   ;;  %s504_s0 = inlined_call_operand.vmem [shape: f32[8,32], index: 0, kind: input, shape index: {}]   ;;  %s505_s1 = inlined_call_operand.vmem [shape: f32[8,24], index: 1, kind: input, shape index: {}]   ;;  %s506_s2 = inlined_call_operand.vmem [shape: f32[1,8,2], index: 2, kind: input, shape index: {}]   ;;  %s507_s3 = inlined_call_operand.vmem [shape: f32[1,8,2], index: 3, kind: input, shape index: {}]   ;;  %s508_s4 = inlined_call_operand.vmem [shape: s32[1,32], index: 4, kind: input, shape index: {}]   ;;  %s509_s5 = inlined_call_operand.vmem [shape: f32[2,32], index: 5, kind: input, shape index: {}]   ;;  %s510_s6 = inlined_call_operand.hbm [shape: f32[2,8,16], index: 6, kind: output, shape index: {}]  }
   0x1   :  { %v24_v0 = vld [vmem:[%s504_s0] sm:$0xff] }
   0x2   :  { %27 = vrot.lane.b32.xlu1 %v24_v0, %s429_s23  ;;  %45 = vst.msk [vmem:[#allocation2 + $0x8] sm:$0xff] %vm43_vm0, %v24_v0  ;;  %46 = vrot.lane.b32.xlu0 %v24_v0, %s430_s24 }
   0x3   :  { %11 = vsyncpa [#allocation4], 0  ;;  %v431_v1 = vmov 0.0   ;;  %s432_s25 = smov 1   ;;  %s433_s26 = smov 31   ;;  %vm434_vm1 = vmmov 0   ;;  %v37_v2 = vlaneseq }
   0x4   :  { %375 = vmatprep.subr.mxu0 %v431_v1  ;;  %381 = vmatprep.mubr.msk.f32.mxu0 %vm434_vm1, %v431_v1  ;;  %v25_v3 = vld [vmem:[%s508_s4] sm:$0x1]  ;;  %v435_v6 = vmov 0   ;;  %vm33_vm4 = vcmask 7168   ;;  %vm52_vm5 = vcmask 252928   ;;  %vm67_vm8 = vcmask 195584  }
   0x5   :  { %v38_v4 = vshrl.u32 %v37_v2, 7  ;;  %vm35_vm2 = vcmp.ge.s32.totalorder %v25_v3, 1  ;;  %vm54_vm3 = vcmp.lt.s32.totalorder %v25_v3, 15  ;;  %v63_v21 = vld [vmem:[%s505_s1] sm:$0xff]  ;;  %vm251_vm9 = vcmask 1041408   ;;  %s437_s9 = smov [#allocation3]  }
   0x6   :  { %30 = vrot.lane.b32.xlu1 %v24_v0, %s432_s25  ;;  %49 = vrot.lane.b32.xlu0 %v24_v0, %s433_s26  ;;  %v36_v7 = vsel %vm35_vm2, 1, %v435_v6  ;;  %v55_v8 = vsel %vm54_vm3, 1, %v435_v6  ;;  %v147_v26 = vld [vmem:[%s509_s5] sm:$0x3]  ;;  %vm244_vm10 = vcmask 15360   ;;  %vm334_vm12 = vcmask 130048  }
   0x7   :  { %v39_v5 = vsub.s32 0, %v38_v4  ;;  %384 = vmatprep.subr.msk.mxu1 %vm43_vm0, %v147_v26  ;;  %v239_v38 = vld [vmem:[%s506_s2] sm:$0xff]  ;;  %s436_s2 = smov 112   ;;  %s347_s10 = sshll.u32 %s437_s9, 4  ;;  %s348_s10 = int_to_ptr.vmem [resolvable:$true] %s347_s10 }
   0x8   :  { %385 = vmatpush3.xpose.msk.msra.mxu1 %vm43_vm0, %v147_v26  ;;  %v240_v41 = vld [vmem:[%s507_s3] sm:$0xff]  ;;  %s407_s3 = scalar_lea.vmem %s348_s10, 256  ;;  %p412_p1 = scmp.lt.s32.totalorder %s348_s10, %s348_s10 }
   0x9   :  { %v40_v9 = vrot.slane %v36_v7, %v39_v5  ;;  %v59_v10 = vrot.slane %v55_v8, %v39_v5  ;;  %v65_v20 = vld [vmem:[#allocation2 + $0x8] sm:$0xff]  ;;  %389 = vmatprep.subr.msk.mxu1 %vm251_vm9, %v147_v26  ;;  %p408_p0 = scmp.ne.s32.totalorder %s348_s10, %s407_s3  ;;  %p413_p2 = scmp.lt.s32.totalorder %s407_s3, %s407_s3 }
   0xb   :  { %vm41_vm6 = vcmp.eq.s32.totalorder %v40_v9, 1  ;;  %vm60_vm7 = vcmp.eq.s32.totalorder %v59_v10, 1  ;;  %p414_p3 = por %p413_p2, %p412_p1 }
   0xd   :  { %p415_p4 = pnand %p414_p3, %p408_p0 }
  0x74   :  { %v28_v11 = vpop.permute.xlu1 %27  ;;  %v47_v12 = vpop.permute.xlu0 %46 }
  0x78   :  { %v31_v13 = vpop.permute.xlu1 %30  ;;  %v50_v14 = vpop.permute.xlu0 %49 }
  0x79   :  { %v34_v15 = vsel %vm33_vm4, %v28_v11, %v31_v13  ;;  %v53_v16 = vsel %vm52_vm5, %v47_v12, %v50_v14 }
  0x7a   :  { %v42_v17 = vsel %vm41_vm6, %v34_v15, 0.0  ;;  %v61_v18 = vsel %vm60_vm7, %v53_v16, 0.0 }
  0x7b   :  { %44 = vst.msk [vmem:[#allocation2] sm:$0xff] %vm43_vm0, %v42_v17  ;;  %62 = vst.msk [vmem:[#allocation2 + $0x10] sm:$0xff] %vm43_vm0, %v61_v18 }
  0x82   :  { %v66_v19 = vld [vmem:[#allocation2 + $0x10] sm:$0xff]  ;;  %v64_v22 = vld [vmem:[#allocation2] sm:$0xff] }
  0x83   :  { %376 = vmatpush3.msra.mxu0 %v66_v19 }
  0x84   :  { %377 = vmatprep.subr.mxu0 %v431_v1 }
  0x85   :  { %378 = vmatpush3.msra.mxu0 %v65_v20 }
  0x86   :  { %379 = vmatprep.subr.mxu0 %v431_v1 }
  0x87   :  { %380 = vmatpush3.msra.mxu0 %v64_v22 }
  0x88   :  { %382 = vmatmul.mubr.msk.f32.vlgmr.msra.gmra.mxu0 %vm67_vm8, %v63_v21 }
 0x148   :  { %v137_v23 = vpop.f32.mrf.mxu0 }
 0x149   :  { %v141_v24 = vsel %vm43_vm0, %v137_v23, 0.0 }
 0x14a   :  { %142 = vadd.xlane.f32.xlu0 %v141_v24  ;;  %v383_v25 = vpop.f32.mrf.mxu0 }
 0x1d3   :  { %v143_v27 = vpop.xlane.xlu0 %142 }
 0x1d4   :  { %v145_v28 = vmul.f32 0.03125, %v143_v27 }
 0x1d6   :  { %v146_v29 = vsub.f32 %v137_v23, %v145_v28 }
 0x1d8   :  { %v148_v30 = vmul.f32 %v146_v29, %v146_v29  ;;  %386 = vmatprep.mubr.msk.f32.mxu1 %vm43_vm0, %v146_v29 }
 0x1da   :  { %387 = vmatmul.mubr.msk.f32.vlgmr.msra.gmra.mxu1 %vm43_vm0, %v148_v30 }
 0x1db   :  { %390 = vmatpush3.msk.msra.mxu1 %vm251_vm9, %v147_v26 }
 0x29a   :  { %v388_v31 = vpop.f32.mrf.mxu1 }
 0x29b   :  { %v234_v34 = vmul.f32 0.0625, %v388_v31 }
 0x29c   :  { %v224_v32 = vpop.f32.mrf.mxu1 }
 0x29d   :  { %v233_v33 = vmul.f32 0.0625, %v224_v32 }
 0x29f   :  { %v235_v35 = vmul.f32 %v233_v33, %v233_v33 }
 0x2a1   :  { %v236_v36 = vsub.f32 %v234_v34, %v235_v35 }
 0x2a3   :  { %v237_v37 = vadd.f32 1e-05, %v236_v36 }
 0x2a5   :  { %405 = vrsqrt.f32 %v237_v37 }
 0x2b2   :  { %v406_v39 = vpop.eup %405 }
 0x2b3   :  { %v241_v40 = vmul.f32 %v406_v39, %v239_v38 }
 0x2b5   :  { %v242_v42 = vmul.f32 %v241_v40, %v233_v33  ;;  %391 = vmatprep.mubr.msk.f32.mxu1 %vm244_vm10, %v241_v40 }
 0x2b7   :  { %v243_v43 = vsub.f32 %v240_v41, %v242_v42 }
 0x2b9   :  { %392 = vmatmul.mubr.msk.f32.vlgmr.msra.gmra.mxu1 %vm244_vm10, %v243_v43 }
 0x379   :  { %v393_v44 = vpop.f32.mrf.mxu1 }
 0x37b   :  { %v320_v45 = vpop.f32.mrf.mxu1 }
 0x37c   :  { %v329_v46 = vmul.f32 %v320_v45, %v146_v29 }
 0x37e   :  { %v330_v47 = vadd.f32 %v393_v44, %v329_v46 }
 0x380   :  { %vm331_vm11 = vcmp.gt.f32.partialorder %v330_v47, 0.0  ;;  %v332_v48 = vmul.f32 0.2, %v330_v47 }
 0x382   :  { %v333_v49 = vsel %vm331_vm11, %v330_v47, %v332_v48 }
 0x383   :  { %337 = vrot.lane.b32.xlu1 %v333_v49, %s436_s2  ;;  %335 = vst.msk [vmem:[#allocation3] sm:$0xff] %vm334_vm12, %v333_v49 }
 0x3f5   :  { %v338_v50 = vpop.permute.xlu1 %337 }
 0x3f6   :  { %341 = vst.msk [vmem:[#allocation3 + $0x8] sm:$0xff] %vm334_vm12, %v338_v50 }
 0x3f7   :  { %418 = shalt.err (!%p415_p4)
}
 0x3f8   :  { %s438_s11 = smov 128   ;;  %s439_s12 = smov 8  }
 0x3f9   :  { %353 = dma.vmem_to_hbm [thread:$0]  %s348_s10, 256, %s510_s6, [#allocation4], %s438_s11, %s438_s11, %s439_s12  }
 0x3fa   :  { %427 = dma.done.wait [#allocation4], 256  }
 0x3fb   :  { %428 = vsyncadd [#allocation4], 4294967040 }
 0x3fc   :  { %357 = vsyncpa [#allocation4], 1 }

</bundles_post_ra>
